<compile_context>
chip_gen: v6e
topology: v6e:2x2x1
jax: 0.10.0
libtpu: 0.0.40
codegen_flags: <defaults>
</compile_context>

<pallas_src>
import numpy as np
import jax
import jax.numpy as jnp
from jax.experimental import pallas as pl
from jax.experimental.pallas import tpu as pltpu

SPATIAL_RADIUS = 7
TEXTURE_CONTRAST = 0.8


# ----------------------------------------------------------------------------
# ChannelAdjustmentLayer1: data-dependent channel gather
# ----------------------------------------------------------------------------
def build_channel_selection(c, target_channels, seed=0):
    """Channel indices matching ChannelAdjustmentLayer1's duplicate/remove logic.

    torch.randint's RNG stream cannot be reproduced in JAX; a deterministic
    numpy RandomState(seed) stands in for it (same distribution of choices).
    """
    rng = np.random.RandomState(seed)
    if c == target_channels:
        return np.arange(c, dtype=np.int32)
    if c < target_channels:
        # every appended channel copies one of the ORIGINAL C channels
        extra = rng.randint(0, c, size=target_channels - c)
        return np.concatenate([np.arange(c), extra]).astype(np.int32)
    # sequential random removal (index drawn from the current channel count)
    keep = list(range(c))
    for _ in range(c - target_channels):
        keep.pop(int(rng.randint(0, len(keep))))
    return np.asarray(keep, dtype=np.int32)


def _channel_gather_kernel(sel_ref, x_ref, o_ref):
    del sel_ref  # consumed by the index_map only
    o_ref[...] = x_ref[...]


def _channel_gather(x, sel):
    B, C, H, W = x.shape
    tc = int(sel.shape[0])
    return pl.pallas_call(
        _channel_gather_kernel,
        out_shape=jax.ShapeDtypeStruct((B, tc, H, W), x.dtype),
        grid_spec=pltpu.PrefetchScalarGridSpec(
            num_scalar_prefetch=1,
            grid=(tc,),
            in_specs=[pl.BlockSpec((B, 1, H, W),
                                   lambda c, sel_ref: (0, sel_ref[c], 0, 0))],
            out_specs=pl.BlockSpec((B, 1, H, W),
                                   lambda c, sel_ref: (0, c, 0, 0)),
        ),
        compiler_params=pltpu.CompilerParams(
            dimension_semantics=("arbitrary",)),
    )(sel, x)


def channel_adjustment_layer1(x, target_channels=256, seed=0):
    """Forward pass of ChannelAdjustmentLayer1."""
    B, C, H, W = x.shape
    if C == target_channels:
        return x
    sel = jnp.asarray(build_channel_selection(C, target_channels, seed), jnp.int32)
    return _channel_gather(x, sel)


# ----------------------------------------------------------------------------
# SpectralDecomp: separable reflect-pad Gaussian blur + high-pass residual
# ----------------------------------------------------------------------------
def _gaussian_1d(radius):
    sigma = radius / 3.0
    xs = np.arange(-radius, radius + 1, dtype=np.float64)
    k = np.exp(-(xs ** 2) / (2.0 * sigma ** 2))
    return k / k.sum()


def _reflect_index(idx, n):
    idx = np.where(idx < 0, -idx, idx)
    idx = np.where(idx >= n, 2 * n - 2 - idx, idx)
    return idx


def _sep_blur_matrix(n, radius):
    """(n, n) matrix M so that (M @ v) == 1-D Gaussian blur of v with reflect pad."""
    k1 = _gaussian_1d(radius)
    offs = np.arange(-radius, radius + 1)
    m = np.zeros((n, n), dtype=np.float64)
    for i in range(n):
        src = _reflect_index(i + offs, n)
        np.add.at(m[i], src, k1)   # duplicate reflected taps accumulate
    return m.astype(np.float32)


def _choose_group(n_maps, w):
    """Number of maps packed side-by-side on the lane axis (target >= 128 lanes)."""
    if w >= 128:
        return 1
    best = 1
    for g in range(1, n_maps + 1):
        if n_maps % g == 0 and g * w <= 512:
            best = g
    return best


def _choose_rows(n_rows, h, gw):
    """Map-rows per grid step: ~1 MiB f32 blocks (pipeline-efficient, VMEM-safe)."""
    t = max(1, min(n_rows, (1 << 20) // (4 * h * gw)))
    while n_rows % t:
        t -= 1
    return t


def _make_spectral_kernel(contrast):
    def kern(mv_ref, mwb_ref, x_ref, low_ref, high_ref, y_ref):
        t_maps, h, gw = x_ref.shape
        # --- W-pass: one flat MXU matmul over all T*H rows.  Reflection is
        #     folded into the block-diagonal banded matrix mwb, so no padded
        #     input and M-dim = T*H feeds the systolic array.
        xb = x_ref[...].astype(jnp.float32).reshape(t_maps * h, gw)
        y_ref[...] = jnp.dot(
            xb, mwb_ref[...],
            preferred_element_type=jnp.float32,
            precision=jax.lax.Precision.HIGHEST,
        ).reshape(t_maps, h, gw)

        mv = mv_ref[...]

        # --- H-pass + high-frequency residual, one map-row at a time.
        def body(t, carry):
            low_t = jnp.dot(mv, y_ref[t],
                            preferred_element_type=jnp.float32,
                            precision=jax.lax.Precision.HIGHEST)
            low_ref[t] = low_t.astype(low_ref.dtype)
            # aligned read of the original block (no offset-7 center slice)
            high_ref[t] = ((x_ref[t].astype(jnp.float32) - low_t) * contrast
                           ).astype(high_ref.dtype)
            return carry

        jax.lax.fori_loop(0, t_maps, body, 0, unroll=t_maps <= 8)

    return kern


def spectral_decomp(x, *, radius=SPATIAL_RADIUS, contrast=TEXTURE_CONTRAST):
    """low = reflect-pad Gaussian(2r+1) blur of x ; high = (x - low) * contrast."""
    B, C, H, W = x.shape
    assert H > radius and W > radius, "reflection padding requires H, W > radius"
    n_maps = B * C

    G = _choose_group(n_maps, W)          # maps per lane-group (G*W lanes)
    gw = G * W
    R = n_maps // G                       # map-rows
    T = _choose_rows(R, H, gw)            # map-rows per grid step

    # Banded separable blur matrices (reflection folded in); constants under jit.
    mv = jnp.asarray(_sep_blur_matrix(H, radius))                   # (H, H)  left-mul
    mw_t = _sep_blur_matrix(W, radius).T                            # (W, W)  right-mul
    mwb = jnp.asarray(np.kron(np.eye(G, dtype=np.float32), mw_t))   # (G*W, G*W) block-diag

    # Pack G maps side-by-side along the lane axis -> lane-dense blocks.
    xg = x.reshape(R, G, H, W).transpose(0, 2, 1, 3).reshape(R, H, gw)

    kern = _make_spectral_kernel(contrast)
    low_g, high_g = pl.pallas_call(
        kern,
        out_shape=(jax.ShapeDtypeStruct((R, H, gw), x.dtype),
                   jax.ShapeDtypeStruct((R, H, gw), x.dtype)),
        grid=(R // T,),
        in_specs=[
            pl.BlockSpec((H, H), lambda i: (0, 0)),        # mv   (reused every step)
            pl.BlockSpec((gw, gw), lambda i: (0, 0)),      # mwb  (reused every step)
            pl.BlockSpec((T, H, gw), lambda i: (i, 0, 0)), # x block
        ],
        out_specs=(
            pl.BlockSpec((T, H, gw), lambda i: (i, 0, 0)),
            pl.BlockSpec((T, H, gw), lambda i: (i, 0, 0)),
        ),
        scratch_shapes=[pltpu.VMEM((T, H, gw), jnp.float32)],
        compiler_params=pltpu.CompilerParams(
            dimension_semantics=("parallel",),             # v7x: shard grid over 2 TCs
            vmem_limit_bytes=32 * 1024 * 1024,
        ),
    )(mv, mwb, xg)

    def ungroup(a):
        return a.reshape(R, H, G, W).transpose(0, 2, 1, 3).reshape(B, C, H, W)

    return ungroup(low_g), ungroup(high_g)


# ----------------------------------------------------------------------------
if __name__ == "__main__":
    key = jax.random.PRNGKey(0)
    B, C, H, W = 2, 4, 16, 16
    x = jax.random.normal(key, (B, C, H, W), dtype=jnp.float32)

    # ---- ChannelAdjustmentLayer1 (the module spec): 4 -> 256 channels.
    target_channels = 256
    sel = build_channel_selection(C, target_channels, seed=0)
    adjusted = channel_adjustment_layer1(x, target_channels=target_channels, seed=0)
    adjusted = jax.block_until_ready(adjusted)
    assert adjusted.shape == (B, target_channels, H, W)
    assert bool(jnp.all(adjusted == x[:, sel]))

    # ---- SpectralDecomp companion kernel (the one the perf review targeted).
    low, high = jax.jit(spectral_decomp)(x)
    jax.block_until_ready((low, high))

    # Pure-JAX reference: reflect pad + full 15x15 Gaussian conv.
    k1 = _gaussian_1d(SPATIAL_RADIUS)
    k2d = jnp.asarray(np.outer(k1, k1), jnp.float32)
    x_pad = jnp.pad(x.reshape(B * C, 1, H, W),
                    ((0, 0), (0, 0), (SPATIAL_RADIUS,) * 2, (SPATIAL_RADIUS,) * 2),
                    mode="reflect")
    ref_low = jax.lax.conv_general_dilated(
        x_pad, k2d[None, None], (1, 1), "VALID",
        dimension_numbers=("NCHW", "OIHW", "NCHW"),
        precision=jax.lax.Precision.HIGHEST,
    ).reshape(B, C, H, W)
    ref_high = (x - ref_low) * TEXTURE_CONTRAST

    assert jnp.allclose(low, ref_low, atol=1e-3, rtol=1e-3)
    assert jnp.allclose(high, ref_high, atol=1e-3, rtol=1e-3)

    print("KERNEL_OK")
</pallas_src>

<mosaic_0001>
module attributes {stable_mosaic.version = 11 : i64} {
  func.func @_channel_gather_kernel(%arg0: i32, %arg1: memref<256xi32, #tpu.memory_space<smem>>, %arg2: memref<2x1x16x16xf32, #tpu.memory_space<vmem>>, %arg3: memref<2x1x16x16xf32, #tpu.memory_space<vmem>>) attributes {dimension_semantics = [#tpu.dimension_semantics<arbitrary>], iteration_bounds = array<i64: 256>, scalar_prefetch = 1 : i64, scratch_operands = 0 : i64, tpu.core_type = #tpu.core_type<tc>, window_params = [{transform_indices = @transform_0, window_bounds = array<i64: 2, 1, 16, 16>}, {transform_indices = @transform_1, window_bounds = array<i64: 2, 1, 16, 16>}]} {
    %c0 = arith.constant 0 : index
    %c0_0 = arith.constant 0 : index
    %c0_1 = arith.constant 0 : index
    %c0_2 = arith.constant 0 : index
    %0 = vector.load %arg2[%c0, %c0_0, %c0_1, %c0_2] : memref<2x1x16x16xf32, #tpu.memory_space<vmem>>, vector<2x1x16x16xf32>
    %c0_3 = arith.constant 0 : index
    %c0_4 = arith.constant 0 : index
    %c0_5 = arith.constant 0 : index
    %c0_6 = arith.constant 0 : index
    %1 = vector.load %arg3[%c0_3, %c0_4, %c0_5, %c0_6] : memref<2x1x16x16xf32, #tpu.memory_space<vmem>>, vector<2x1x16x16xf32>
    tpu.vector_store %arg3[%c0_3, %c0_4, %c0_5, %c0_6], %0 {strides = array<i32>} : memref<2x1x16x16xf32, #tpu.memory_space<vmem>>, vector<2x1x16x16xf32>,
    return
  }
  func.func @transform_0(%arg0: i32, %arg1: memref<256xi32, #tpu.memory_space<smem>>) -> (i32, i32, i32, i32) {
    %0 = arith.index_cast %arg0 : i32 to index
    %1 = memref.load %arg1[%0] : memref<256xi32, #tpu.memory_space<smem>>
    %c0_i32 = arith.constant 0 : i32
    %c0_i32_0 = arith.constant 0 : i32
    %c0_i32_1 = arith.constant 0 : i32
    %c0_i32_2 = arith.constant 0 : i32
    return %c0_i32, %1, %c0_i32_0, %c0_i32_1 : i32, i32, i32, i32
  }
  func.func @transform_1(%arg0: i32, %arg1: memref<256xi32, #tpu.memory_space<smem>>) -> (i32, i32, i32, i32) {
    %c0_i32 = arith.constant 0 : i32
    %c0_i32_0 = arith.constant 0 : i32
    %c0_i32_1 = arith.constant 0 : i32
    %c0_i32_2 = arith.constant 0 : i32
    return %c0_i32, %arg0, %c0_i32_0, %c0_i32_1 : i32, i32, i32, i32
  }
}

</mosaic_0001>

<bundles_post_ra>
// kernel: tpu_custom_call.1
= control target key start
LH: loop header
LB: loop body
LE: loop exit
PB: predicated region body
PF: predicated region fallthrough
CT: control target
= control target key end

     0   :  { %s437_s9 = smov [#allocation3]   ;;  %s587_s0 = inlined_call_operand.hbm [shape: s32[256], index: 0, kind: input, shape index: {}]   ;;  %s588_s1 = inlined_call_operand.hbm [shape: f32[2,4,16,16], index: 1, kind: input, shape index: {}]   ;;  %s589_s2 = inlined_call_operand.vmem [shape: f32[2,256,16,16], index: 2, kind: output, shape index: {}]  }
   0x1   :  { %8 = dma.hbm_to_smem %s587_s0, 32, %s437_s9, [#allocation2] }
   0x2   :  { %407 = dma.done.wait [#allocation2], 32 }
   0x3   :  { %408 = vsyncadd [#allocation2], 4294967264 }
   0x4   :  { %10 = sfence }
   0x5   :  { %11 = vsyncpa [#allocation5], 0 }
   0x6   :  { %13 = vsyncpa [#allocation5 + $0x1], 0  ;;  %s462_s12 = smov 0   ;;  %s464_s13 = smov 0  }
   0x7   :  { %s466_s14 = smov 0   ;;  %s468_s15 = smov 0  }
   0x8   :  { %s470_s16 = smov 0   ;;  %s472_s17 = smov 0  }
   0x9 LB: > { %s491_s0 = sadd.s32 4294967295, %s435_s17   ;;  %s494_s18 = sadd.s32 1, %s435_s17   ;;  %s435_s17 = sphi %s472_s17, %s598_s17   ;;  %s431_s16 = sphi %s470_s16, %s597_s16   ;;  %s427_s15 = sphi %s468_s15, %s596_s15   ;;  %s423_s14 = sphi %s466_s14, %s595_s14   ;;  %s419_s13 = sphi %s464_s13, %s594_s13   ;;  %s415_s12 = sphi %s462_s12, %s593_s12  }
   0xa   : > { %s23_s19 = sld [smem:[#allocation3 + %s435_s17]]  ;;  %s28_s20 = sadd.s32 1, %s431_s16 }
   0xb   : > { %s24_s21 = sld [smem:[#allocation3 + %s494_s18]]  ;;  %p35_p0 = scmp.ne.s32.totalorder %s431_s16, %s427_s15 }
   0xc   : > { %p36_p1 = scmp.eq.s32.totalorder %s435_s17, 0  ;;  %p41_p2 = scmp.ne.s32.totalorder %s427_s15, %s423_s14 }
   0xd   : > { %p42_p3 = scmp.eq.s32.totalorder %s491_s0, 0  ;;  %s51_s22 = ssub.s32 %s435_s17, %s494_s18 }
   0xe   : > { %p506_p4 = por %p36_p1, %p35_p0  ;;  %p52_p5 = scmp.eq.s32.totalorder %s51_s22, 0 }
   0xf   : > { %p510_p6 = por %p42_p3, %p41_p2  ;;  %s54_s25 = sadd.s32 1, %s419_s13 }
  0x10   : > { %s516_s26 = scalar_select %p52_p5, %s419_s13, %s54_s25  }
  0x11   : > { %s25_s27 = ssub.s32 %s23_s19, %s24_s21  ;;  %p64_p7 = scmp.ne.s32.totalorder %s419_s13, %s415_s12 }
  0x12   : > { %p26_p8 = scmp.eq.s32.totalorder %s25_s27, 0  ;;  %p65_p9 = scmp.eq.s32.totalorder %s491_s0, 255 }
  0x13   : > { %p293_p11 = scmp.ge.s32.totalorder %s435_s17, 256 }
  0x14   : > { %s522_s28 = scalar_select %p26_p8, %s431_s16, %s28_s20  }
  0x15   : > { %p524_p10 = por %p65_p9, %p64_p7  ;;  %87 = sbr.rel (%p293_p11) target bundleno = 42 (0x2a), region = 16 }
  0x1a   : > { %s91_s30 = sand.u32 1, %s431_s16   ;;  %s438_s4 = smov 1024  }
  0x1b   : > { %s294_s3 = sshll.u32 %s91_s30, 5  ;;  %312 = sst [smem:[#allocation8]] (%p506_p4), %s438_s4 }
  0x1c   : > { %s309_s5 = scalar_select %p506_p4, [#allocation3], [#allocation9] }
  0x1d   : > { %s310_s6 = scalar_select %p506_p4, %s435_s17, 0 }
  0x1e   : > { %s311_s7 = scalar_select %p506_p4, [#allocation0], [#allocation10] }
  0x1f   : > { %s96_s8 = sld [smem:[%s309_s5 + %s310_s6]]  ;;  %s95_s9 = scalar_lea.vmem [#allocation4], %s294_s3 }
  0x20   : > { %s115_s10 = sshll.u32 %s95_s9, 4  ;;  %s107_s11 = sld [smem:[%s311_s7]]   ;;  %s116_s10 = int_to_ptr.vmem [resolvable:$true] %s115_s10 }
  0x21   : > { %s439_s14 = smov 256   ;;  %s440_s19 = smov 2  }
  0x22   : > { %313 = sst [smem:[#allocation8 + $0x1]] (%p506_p4), %s439_s14  ;;  %s441_s20 = smov 128  }
  0x23   : > { %314 = sst [smem:[#allocation8 + $0x2]] (%p506_p4), %s440_s19  ;;  %s442_s5 = smov 8  }
  0x24   : > { %315 = sst [smem:[#allocation8 + $0x3]] (%p506_p4), %s441_s20  ;;  %s92_s6 = scalar_lea.sflag [#allocation5], %s91_s30 }
  0x25   : > { %s307_s21 = sshll.u32 %s96_s8, 8  ;;  %316 = sst [smem:[#allocation8 + $0x4]] (%p506_p4), %s441_s20 }
  0x26   : > { %s102_s27 = scalar_lea.hbm %s588_s1, %s307_s21  ;;  %s297_s3 = sshll.u32 %s107_s11, 26 }
  0x27   : > { %s298_s4 = sadd.s32 134217728, %s297_s3  ;;  %317 = sst [smem:[#allocation8 + $0x5]] (%p506_p4), %s442_s5 }
  0x28   : > { %s443_s7 = smov 131072  }
  0x29   : > { %318 = dma.general (%p506_p4), %s102_s27, 512, %s116_s10, %s92_s6, %s443_s7, [#allocation8], %s298_s4, 0  }
  0x2a PF: > { %p299_p12 = scmp.ge.s32.totalorder %s435_s17, 1  ;;  %p136_p13 = scmp.lt.s32.totalorder %s435_s17, 257 }
  0x2c   : > { %p137_p0 = pnand %p299_p12, %p136_p13 }
  0x2d   : > { %s142_s8 = sand.u32 (!%p137_p0), 1, %s427_s15  }
  0x2e   : > { %140 = sbr.rel (%p137_p0) target bundleno = 65 (0x41), region = 24  ;;  %s300_s9 = sshll.u32 (!%p137_p0), %s142_s8, 5 }
  0x2f   : > { %s143_s11 = scalar_lea.sflag (!%p137_p0), [#allocation5], %s142_s8  ;;  %s146_s14 = scalar_lea.vmem (!%p137_p0), [#allocation4], %s300_s9 }
  0x33   : > { %410 = dma.done.wait (%p510_p6), %s143_s11, 512  }
  0x34   : > { %412 = vsyncadd (%p510_p6), %s143_s11, 4294966784  ;;  %s161_s23 = sand.u32 1, %s415_s12   ;;  %vm169_vm0 = vcmask 130048   ;;  %v165_v0 = vld [vmem:[%s146_s14] sm:$0xff]  ;;  %v166_v1 = vld [vmem:[%s146_s14 + $0x8] sm:$0xff]  ;;  %180 = sbr.rel (!%p524_p10) target bundleno = 65 (0x41), region = 32 }
  0x35   : > { %s301_s30 = sshll.u32 %s161_s23, 5  ;;  %v167_v2 = vld [vmem:[%s146_s14 + $0x10] sm:$0xff]  ;;  %v168_v3 = vld [vmem:[%s146_s14 + $0x18] sm:$0xff]  ;;  %s308_s10 = sshll.u32 (%p524_p10), %s491_s0, 4 }
  0x36   : > { %s163_s17 = scalar_lea.vmem [#allocation6], %s301_s30  ;;  %s183_s19 = scalar_lea.vmem (%p524_p10), %s589_s2, %s308_s10 }
  0x37   : > { %170 = vst.msk [vmem:[%s163_s17] sm:$0xff] %vm169_vm0, %v165_v0  ;;  %171 = vst.msk [vmem:[%s163_s17 + $0x8] sm:$0xff] %vm169_vm0, %v166_v1 }
  0x38   : > { %172 = vst.msk [vmem:[%s163_s17 + $0x10] sm:$0xff] %vm169_vm0, %v167_v2  ;;  %173 = vst.msk [vmem:[%s163_s17 + $0x18] sm:$0xff] %vm169_vm0, %v168_v3 }
  0x3e   : > { %v218_v4 = vld [vmem:[%s163_s17] sm:$0xff]  ;;  %v220_v5 = vld [vmem:[%s163_s17 + $0x8] sm:$0xff] }
  0x3f   : > { %v222_v6 = vld [vmem:[%s163_s17 + $0x10] sm:$0xff]  ;;  %v224_v7 = vld [vmem:[%s163_s17 + $0x18] sm:$0xff]  ;;  %219 = vst [vmem:[%s183_s19] sm:$0xff] %v218_v4  ;;  %221 = vst [vmem:[%s183_s19 + $0x8] sm:$0xff] %v220_v5 }
  0x40   : > { %223 = vst [vmem:[%s183_s19 + $0x1000] sm:$0xff] %v222_v6  ;;  %225 = vst [vmem:[%s183_s19 + $0x1008] sm:$0xff] %v224_v7 }
  0x41 PF: > { %p16_p1 = scmp.ge.s32.totalorder %s494_s18, 258   ;;  %s593_s12 = smov %s419_s13 }
  0x42   : > { %s594_s13 = smov %s516_s26  ;;  %s595_s14 = smov %s427_s15 }
  0x43   : > { %s596_s15 = smov %s431_s16  ;;  %s597_s16 = smov %s522_s28 }
  0x44   : > { %s598_s17 = smov %s494_s18  ;;  %18 = sbr.rel (!%p16_p1) target bundleno = 9 (0x9), region = 107 }
  0x49   :  { %241 = vsyncpa [#allocation5], 1 }
  0x4a   :  { %243 = vsyncpa [#allocation5 + $0x1], 1 }

</bundles_post_ra>
